<compile_context>
chip_gen: v7x
topology: tpu7x:2x2x1
jax: 0.10.0
libtpu: 0.0.40
codegen_flags: <defaults>
</compile_context>

<pallas_src>
import math
import functools

import jax
import jax.numpy as jnp
from jax.experimental import pallas as pl
from jax.experimental.pallas import tpu as pltpu


# ----------------------------------------------------------------------------
# Kernel A: fused QKV projection, head-major output.
#   y = x_tile @ [Wq|Wk|Wv] + [bq|bk|bv]   (one (ts, 3H) MXU matmul)
#   then split per head and store (n_head, ts, hs) blocks (VMEM-local).
# ----------------------------------------------------------------------------
def _qkv_proj_kernel(x_ref, w_ref, b_ref, q_ref, k_ref, v_ref,
                     *, n_head, head_size, hidden):
    x = x_ref[0]                                            # (ts, H)
    y = jnp.dot(x, w_ref[...],
                preferred_element_type=jnp.float32) + b_ref[...]   # (ts, 3H)
    H, hs = hidden, head_size
    for h in range(n_head):                                 # static loop
        q_ref[0, h] = y[:, h * hs:(h + 1) * hs].astype(q_ref.dtype)
        k_ref[0, h] = y[:, H + h * hs:H + (h + 1) * hs].astype(k_ref.dtype)
        v_ref[0, h] = y[:, 2 * H + h * hs:2 * H + (h + 1) * hs].astype(v_ref.dtype)


# ----------------------------------------------------------------------------
# Kernel B: flash-style causal attention over a lower-triangle-only flat grid
# (scalar-prefetched (qi, ki) tables), heads batched, with concat + output
# projection fused into the finalize epilogue.
# ----------------------------------------------------------------------------
def _flash_attn_kernel(qi_tab_ref, ki_tab_ref,                # scalar prefetch
                       q_ref, k_ref, v_ref, wp_ref, bp_ref,   # inputs
                       o_ref,                                  # output
                       m_scr, l_scr, acc_scr,                  # scratch
                       *, tq, tk, scale):
    t = pl.program_id(1)
    qi = qi_tab_ref[t]
    ki = ki_tab_ref[t]
    q_start = qi * tq
    k_start = ki * tk

    @pl.when(ki == 0)
    def _init():
        m_scr[...] = jnp.full(m_scr.shape, -jnp.inf, dtype=m_scr.dtype)
        l_scr[...] = jnp.zeros_like(l_scr)
        acc_scr[...] = jnp.zeros_like(acc_scr)

    q = q_ref[0]                                            # (nh, tq, hs)
    k = k_ref[0]                                            # (nh, tk, hs)
    v = v_ref[0]                                            # (nh, tk, hs)

    # Head-batched scores (nh, tq, tk), contraction over head_size.
    s = jnp.einsum('hqd,hkd->hqk', q, k, preferred_element_type=jnp.float32)

    def update(scores):
        m_prev = m_scr[...]                                 # (nh, tq, 1)
        m_new = jnp.maximum(m_prev, jnp.max(scores, axis=-1, keepdims=True))
        alpha = jnp.exp(m_prev - m_new)
        p = jnp.exp(scores - m_new)                         # (nh, tq, tk)
        l_scr[...] = alpha * l_scr[...] + jnp.sum(p, axis=-1, keepdims=True)
        acc_scr[...] = alpha * acc_scr[...] + jnp.einsum(
            'hqk,hkd->hqd', p.astype(v.dtype), v,
            preferred_element_type=jnp.float32)             # (nh, tq, hs)
        m_scr[...] = m_new

    # Only diagonal-straddling tiles pay for the mask; interior tiles
    # (fully below the diagonal, the common case) skip the iota/select work.
    needs_mask = (k_start + tk - 1) > q_start

    @pl.when(jnp.logical_not(needs_mask))
    def _interior():
        update(s)

    @pl.when(needs_mask)
    def _straddle():
        row = q_start + jax.lax.broadcasted_iota(jnp.int32, (tq, tk), 0)
        col = k_start + jax.lax.broadcasted_iota(jnp.int32, (tq, tk), 1)
        update(jnp.where(row >= col, s, -jnp.inf))

    # Last valid kv tile for this q tile (lower-triangle enumeration).
    last_ki = (q_start + tq - 1) // tk

    @pl.when(ki == last_ki)
    def _finalize():
        # softmax normalizer + post-softmax 1/sqrt(H) scale on (nh, tq, 1).
        inv_l = pl.reciprocal(l_scr[...], approx=False) * scale
        attn = (acc_scr[...] * inv_l).astype(wp_ref.dtype)  # (nh, tq, hs)
        # concat-over-heads @ Wp == sum_h attn_h @ Wp_h
        yh = jnp.einsum('hqd,hdn->hqn', attn, wp_ref[...],
                        preferred_element_type=jnp.float32)  # (nh, tq, H)
        o_ref[0] = (jnp.sum(yh, axis=0) + bp_ref[...]).astype(o_ref.dtype)


# ----------------------------------------------------------------------------
# Wrapper
# ----------------------------------------------------------------------------
def multi_head_attention(x, wq, bq, wk, bk, wv, bv, wp, bp,
                         *, ts=512, tq=256, tk=256):
    """x: (B, S, H); wq/wk/wv: (n_head, H, hs); bq/bk/bv: (n_head, hs);
    wp: (H, H); bp: (1, H).  Weights are pre-transposed (y = x @ W + b)."""
    B, S, H = x.shape
    n_head, _, hs = wq.shape
    assert n_head * hs == H

    ts = min(ts, S)
    tq = min(tq, S)
    tk = min(tk, S)
    # Toy/simple path: require even tiling.
    assert S % ts == 0 and S % tq == 0 and S % tk == 0

    # One-time wrapper-side weight packing (layout plumbing, not compute):
    #   (n_head, H, hs) -> (H, n_head*hs); concat q|k|v columns -> (H, 3H)
    pack_w = lambda w: jnp.transpose(w, (1, 0, 2)).reshape(H, H)
    w_all = jnp.concatenate([pack_w(wq), pack_w(wk), pack_w(wv)], axis=1)
    b_all = jnp.concatenate([bq.reshape(1, H), bk.reshape(1, H),
                             bv.reshape(1, H)], axis=1)          # (1, 3H)
    wp_h = wp.reshape(n_head, hs, H)      # per-head row-slices of out proj
    bp_f = bp.reshape(1, H)

    itemsize = jnp.dtype(x.dtype).itemsize

    # ---- pass 1: fused QKV projection, head-major output -------------------
    vmem_a = (2 * (ts * H + H * 3 * H + 3 * H + 3 * n_head * ts * hs) * itemsize
              + ts * 3 * H * 4)
    qkv_kernel = functools.partial(_qkv_proj_kernel, n_head=n_head,
                                   head_size=hs, hidden=H)
    q_h, k_h, v_h = pl.pallas_call(
        qkv_kernel,
        out_shape=tuple(jax.ShapeDtypeStruct((B, n_head, S, hs), x.dtype)
                        for _ in range(3)),
        grid=(B, S // ts),
        in_specs=[
            pl.BlockSpec((1, ts, H), lambda b, s: (b, s, 0)),     # x tile
            pl.BlockSpec((H, 3 * H), lambda b, s: (0, 0)),        # fused W
            pl.BlockSpec((1, 3 * H), lambda b, s: (0, 0)),        # fused b
        ],
        out_specs=tuple(pl.BlockSpec((1, n_head, ts, hs),
                                     lambda b, s: (b, 0, s, 0))
                        for _ in range(3)),
        compiler_params=pltpu.CompilerParams(
            dimension_semantics=("parallel", "parallel"),
            vmem_limit_bytes=int(min(64 * 2**20, max(32 * 2**20, 2 * vmem_a)))),
    )(x, w_all, b_all)

    # ---- pass 2: flash attention over lower-triangle tiles only ------------
    n_q, n_k = S // tq, S // tk
    pairs = [(qi, ki) for qi in range(n_q) for ki in range(n_k)
             if ki * tk <= qi * tq + tq - 1]
    qi_tab = jnp.asarray([p[0] for p in pairs], dtype=jnp.int32)
    ki_tab = jnp.asarray([p[1] for p in pairs], dtype=jnp.int32)
    T = len(pairs)

    vmem_b = (2 * (n_head * tq * hs + 2 * n_head * tk * hs
                   + n_head * hs * H + 3 * H + tq * H) * itemsize
              + (2 * n_head * tq + n_head * tq * hs) * 4)
    kernel = functools.partial(_flash_attn_kernel, tq=tq, tk=tk,
                               scale=1.0 / math.sqrt(H))
    out = pl.pallas_call(
        kernel,
        out_shape=jax.ShapeDtypeStruct((B, S, H), x.dtype),
        grid_spec=pltpu.PrefetchScalarGridSpec(
            num_scalar_prefetch=2,
            grid=(B, T),
            in_specs=[
                pl.BlockSpec((1, n_head, tq, hs),
                             lambda b, t, qt, kt: (b, 0, qt[t], 0)),
                pl.BlockSpec((1, n_head, tk, hs),
                             lambda b, t, qt, kt: (b, 0, kt[t], 0)),
                pl.BlockSpec((1, n_head, tk, hs),
                             lambda b, t, qt, kt: (b, 0, kt[t], 0)),
                pl.BlockSpec((n_head, hs, H),
                             lambda b, t, qt, kt: (0, 0, 0)),
                pl.BlockSpec((1, H), lambda b, t, qt, kt: (0, 0)),
            ],
            out_specs=pl.BlockSpec((1, tq, H),
                                   lambda b, t, qt, kt: (b, qt[t], 0)),
            scratch_shapes=[
                pltpu.VMEM((n_head, tq, 1), jnp.float32),   # running max
                pltpu.VMEM((n_head, tq, 1), jnp.float32),   # running sum
                pltpu.VMEM((n_head, tq, hs), jnp.float32),  # output accum
            ]),
        compiler_params=pltpu.CompilerParams(
            dimension_semantics=("parallel", "arbitrary"),
            vmem_limit_bytes=int(min(64 * 2**20, max(32 * 2**20, 2 * vmem_b)))),
    )(qi_tab, ki_tab, q_h, k_h, v_h, wp_h, bp_f)
    return out


# ----------------------------------------------------------------------------
# Pure-JAX reference replicating the PyTorch forward.
# ----------------------------------------------------------------------------
def reference(x, wq, bq, wk, bk, wv, bv, wp, bp):
    B, S, H = x.shape
    n_head = wq.shape[0]
    causal = jnp.tril(jnp.ones((S, S), dtype=bool))
    outs = []
    for h in range(n_head):
        q = x @ wq[h] + bq[h]
        k = x @ wk[h] + bk[h]
        v = x @ wv[h] + bv[h]
        w = q @ jnp.swapaxes(k, -2, -1)
        w = jnp.where(causal[None, :, :], w, -jnp.inf)
        w = jax.nn.softmax(w, axis=-1) / math.sqrt(H)
        outs.append(w @ v)
    concat = jnp.concatenate(outs, axis=-1)
    return concat @ wp + bp[0]


if __name__ == "__main__":
    # Small config consistent with the module: hidden_dim = n_head * head_size
    B, S = 2, 8
    hidden_dim, n_head = 32, 4
    head_size = hidden_dim // n_head

    key = jax.random.PRNGKey(0)
    ks = jax.random.split(key, 9)
    scale = 0.1
    x  = jax.random.normal(ks[0], (B, S, hidden_dim), dtype=jnp.float32)
    wq = scale * jax.random.normal(ks[1], (n_head, hidden_dim, head_size), dtype=jnp.float32)
    bq = scale * jax.random.normal(ks[2], (n_head, head_size), dtype=jnp.float32)
    wk = scale * jax.random.normal(ks[3], (n_head, hidden_dim, head_size), dtype=jnp.float32)
    bk = scale * jax.random.normal(ks[4], (n_head, head_size), dtype=jnp.float32)
    wv = scale * jax.random.normal(ks[5], (n_head, hidden_dim, head_size), dtype=jnp.float32)
    bv = scale * jax.random.normal(ks[6], (n_head, head_size), dtype=jnp.float32)
    wp = scale * jax.random.normal(ks[7], (hidden_dim, hidden_dim), dtype=jnp.float32)
    bp = scale * jax.random.normal(ks[8], (1, hidden_dim), dtype=jnp.float32)

    out = multi_head_attention(x, wq, bq, wk, bk, wv, bv, wp, bp)
    out = jax.block_until_ready(out)

    ref = reference(x, wq, bq, wk, bk, wv, bv, wp, bp)
    assert out.shape == (B, S, hidden_dim)
    assert jnp.allclose(out, ref, atol=1e-5, rtol=1e-5), \
        f"max abs diff {jnp.max(jnp.abs(out - ref))}"

    print("KERNEL_OK")
</pallas_src>

<mosaic_0001>
module attributes {stable_mosaic.version = 11 : i64} {
  func.func @_qkv_proj_kernel(%arg0: i32, %arg1: i32, %arg2: memref<1x8x32xf32, #tpu.memory_space<vmem>>, %arg3: memref<32x96xf32, #tpu.memory_space<vmem>>, %arg4: memref<1x96xf32, #tpu.memory_space<vmem>>, %arg5: memref<1x4x8x8xf32, #tpu.memory_space<vmem>>, %arg6: memref<1x4x8x8xf32, #tpu.memory_space<vmem>>, %arg7: memref<1x4x8x8xf32, #tpu.memory_space<vmem>>) attributes {dimension_semantics = [#tpu.dimension_semantics<parallel>, #tpu.dimension_semantics<parallel>], iteration_bounds = array<i64: 2, 1>, scalar_prefetch = 0 : i64, scratch_operands = 0 : i64, tpu.core_type = #tpu.core_type<tc>, window_params = [{transform_indices = @transform_0, window_bounds = array<i64: 1, 8, 32>}, {pipeline_mode = #tpu.pipeline_mode<synchronous>, transform_indices = @transform_1, window_bounds = array<i64: 32, 96>}, {pipeline_mode = #tpu.pipeline_mode<synchronous>, transform_indices = @transform_2, window_bounds = array<i64: 1, 96>}, {transform_indices = @transform_3, window_bounds = array<i64: 1, 4, 8, 8>}, {transform_indices = @transform_4, window_bounds = array<i64: 1, 4, 8, 8>}, {transform_indices = @transform_5, window_bounds = array<i64: 1, 4, 8, 8>}]} {
    %c0 = arith.constant 0 : index
    %c0_0 = arith.constant 0 : index
    %c0_1 = arith.constant 0 : index
    %0 = vector.load %arg2[%c0, %c0_0, %c0_1] : memref<1x8x32xf32, #tpu.memory_space<vmem>>, vector<1x8x32xf32>
    %1 = vector.shape_cast %0 : vector<1x8x32xf32> to vector<8x32xf32>
    %c0_2 = arith.constant 0 : index
    %c0_3 = arith.constant 0 : index
    %2 = vector.load %arg3[%c0_2, %c0_3] : memref<32x96xf32, #tpu.memory_space<vmem>>, vector<32x96xf32>
    %cst = arith.constant dense<0.000000e+00> : vector<8x96xf32>
    %3 = tpu.matmul %1, %2, %cst {dimension_numbers = #tpu.dot_dimension_numbers<[1], [0], [0], [1], [0, 0, 1, 1], [], []>} : vector<8x32xf32>, vector<32x96xf32>, vector<8x96xf32> -> vector<8x96xf32>
    %c0_4 = arith.constant 0 : index
    %c0_5 = arith.constant 0 : index
    %4 = vector.load %arg4[%c0_4, %c0_5] : memref<1x96xf32, #tpu.memory_space<vmem>>, vector<1x96xf32>
    %5 = vector.broadcast %4 : vector<1x96xf32> to vector<8x96xf32>
    %6 = arith.addf %3, %5 : vector<8x96xf32>
    %7 = vector.extract_strided_slice %6 {offsets = [0, 0], sizes = [8, 8], strides = [1, 1]} : vector<8x96xf32> to vector<8x8xf32>
    %c0_6 = arith.constant 0 : index
    %c0_7 = arith.constant 0 : index
    %c0_8 = arith.constant 0 : index
    %c0_9 = arith.constant 0 : index
    %8 = vector.load %arg5[%c0_6, %c0_7, %c0_8, %c0_9] : memref<1x4x8x8xf32, #tpu.memory_space<vmem>>, vector<1x1x8x8xf32>
    %9 = vector.shape_cast %8 : vector<1x1x8x8xf32> to vector<8x8xf32>
    %10 = vector.shape_cast %7 : vector<8x8xf32> to vector<1x1x8x8xf32>
    tpu.vector_store %arg5[%c0_6, %c0_7, %c0_8, %c0_9], %10 {strides = array<i32>} : memref<1x4x8x8xf32, #tpu.memory_space<vmem>>, vector<1x1x8x8xf32>,
    %11 = vector.extract_strided_slice %6 {offsets = [0, 32], sizes = [8, 8], strides = [1, 1]} : vector<8x96xf32> to vector<8x8xf32>
    %c0_10 = arith.constant 0 : index
    %c0_11 = arith.constant 0 : index
    %c0_12 = arith.constant 0 : index
    %c0_13 = arith.constant 0 : index
    %12 = vector.load %arg6[%c0_10, %c0_11, %c0_12, %c0_13] : memref<1x4x8x8xf32, #tpu.memory_space<vmem>>, vector<1x1x8x8xf32>
    %13 = vector.shape_cast %12 : vector<1x1x8x8xf32> to vector<8x8xf32>
    %14 = vector.shape_cast %11 : vector<8x8xf32> to vector<1x1x8x8xf32>
    tpu.vector_store %arg6[%c0_10, %c0_11, %c0_12, %c0_13], %14 {strides = array<i32>} : memref<1x4x8x8xf32, #tpu.memory_space<vmem>>, vector<1x1x8x8xf32>,
    %15 = vector.extract_strided_slice %6 {offsets = [0, 64], sizes = [8, 8], strides = [1, 1]} : vector<8x96xf32> to vector<8x8xf32>
    %c0_14 = arith.constant 0 : index
    %c0_15 = arith.constant 0 : index
    %c0_16 = arith.constant 0 : index
    %c0_17 = arith.constant 0 : index
    %16 = vector.load %arg7[%c0_14, %c0_15, %c0_16, %c0_17] : memref<1x4x8x8xf32, #tpu.memory_space<vmem>>, vector<1x1x8x8xf32>
    %17 = vector.shape_cast %16 : vector<1x1x8x8xf32> to vector<8x8xf32>
    %18 = vector.shape_cast %15 : vector<8x8xf32> to vector<1x1x8x8xf32>
    tpu.vector_store %arg7[%c0_14, %c0_15, %c0_16, %c0_17], %18 {strides = array<i32>} : memref<1x4x8x8xf32, #tpu.memory_space<vmem>>, vector<1x1x8x8xf32>,
    %19 = vector.extract_strided_slice %6 {offsets = [0, 8], sizes = [8, 8], strides = [1, 1]} : vector<8x96xf32> to vector<8x8xf32>
    %c0_18 = arith.constant 0 : index
    %c1 = arith.constant 1 : index
    %c0_19 = arith.constant 0 : index
    %c0_20 = arith.constant 0 : index
    %20 = vector.load %arg5[%c0_18, %c1, %c0_19, %c0_20] : memref<1x4x8x8xf32, #tpu.memory_space<vmem>>, vector<1x1x8x8xf32>
    %21 = vector.shape_cast %20 : vector<1x1x8x8xf32> to vector<8x8xf32>
    %22 = vector.shape_cast %19 : vector<8x8xf32> to vector<1x1x8x8xf32>
    tpu.vector_store %arg5[%c0_18, %c1, %c0_19, %c0_20], %22 {strides = array<i32>} : memref<1x4x8x8xf32, #tpu.memory_space<vmem>>, vector<1x1x8x8xf32>,
    %23 = vector.extract_strided_slice %6 {offsets = [0, 40], sizes = [8, 8], strides = [1, 1]} : vector<8x96xf32> to vector<8x8xf32>
    %c0_21 = arith.constant 0 : index
    %c1_22 = arith.constant 1 : index
    %c0_23 = arith.constant 0 : index
    %c0_24 = arith.constant 0 : index
    %24 = vector.load %arg6[%c0_21, %c1_22, %c0_23, %c0_24] : memref<1x4x8x8xf32, #tpu.memory_space<vmem>>, vector<1x1x8x8xf32>
    %25 = vector.shape_cast %24 : vector<1x1x8x8xf32> to vector<8x8xf32>
    %26 = vector.shape_cast %23 : vector<8x8xf32> to vector<1x1x8x8xf32>
    tpu.vector_store %arg6[%c0_21, %c1_22, %c0_23, %c0_24], %26 {strides = array<i32>} : memref<1x4x8x8xf32, #tpu.memory_space<vmem>>, vector<1x1x8x8xf32>,
    %27 = vector.extract_strided_slice %6 {offsets = [0, 72], sizes = [8, 8], strides = [1, 1]} : vector<8x96xf32> to vector<8x8xf32>
    %c0_25 = arith.constant 0 : index
    %c1_26 = arith.constant 1 : index
    %c0_27 = arith.constant 0 : index
    %c0_28 = arith.constant 0 : index
    %28 = vector.load %arg7[%c0_25, %c1_26, %c0_27, %c0_28] : memref<1x4x8x8xf32, #tpu.memory_space<vmem>>, vector<1x1x8x8xf32>
    %29 = vector.shape_cast %28 : vector<1x1x8x8xf32> to vector<8x8xf32>
    %30 = vector.shape_cast %27 : vector<8x8xf32> to vector<1x1x8x8xf32>
    tpu.vector_store %arg7[%c0_25, %c1_26, %c0_27, %c0_28], %30 {strides = array<i32>} : memref<1x4x8x8xf32, #tpu.memory_space<vmem>>, vector<1x1x8x8xf32>,
    %31 = vector.extract_strided_slice %6 {offsets = [0, 16], sizes = [8, 8], strides = [1, 1]} : vector<8x96xf32> to vector<8x8xf32>
    %c0_29 = arith.constant 0 : index
    %c2 = arith.constant 2 : index
    %c0_30 = arith.constant 0 : index
    %c0_31 = arith.constant 0 : index
    %32 = vector.load %arg5[%c0_29, %c2, %c0_30, %c0_31] : memref<1x4x8x8xf32, #tpu.memory_space<vmem>>, vector<1x1x8x8xf32>
    %33 = vector.shape_cast %32 : vector<1x1x8x8xf32> to vector<8x8xf32>
    %34 = vector.shape_cast %31 : vector<8x8xf32> to vector<1x1x8x8xf32>
    tpu.vector_store %arg5[%c0_29, %c2, %c0_30, %c0_31], %34 {strides = array<i32>} : memref<1x4x8x8xf32, #tpu.memory_space<vmem>>, vector<1x1x8x8xf32>,
    %35 = vector.extract_strided_slice %6 {offsets = [0, 48], sizes = [8, 8], strides = [1, 1]} : vector<8x96xf32> to vector<8x8xf32>
    %c0_32 = arith.constant 0 : index
    %c2_33 = arith.constant 2 : index
    %c0_34 = arith.constant 0 : index
    %c0_35 = arith.constant 0 : index
    %36 = vector.load %arg6[%c0_32, %c2_33, %c0_34, %c0_35] : memref<1x4x8x8xf32, #tpu.memory_space<vmem>>, vector<1x1x8x8xf32>
    %37 = vector.shape_cast %36 : vector<1x1x8x8xf32> to vector<8x8xf32>
    %38 = vector.shape_cast %35 : vector<8x8xf32> to vector<1x1x8x8xf32>
    tpu.vector_store %arg6[%c0_32, %c2_33, %c0_34, %c0_35], %38 {strides = array<i32>} : memref<1x4x8x8xf32, #tpu.memory_space<vmem>>, vector<1x1x8x8xf32>,
    %39 = vector.extract_strided_slice %6 {offsets = [0, 80], sizes = [8, 8], strides = [1, 1]} : vector<8x96xf32> to vector<8x8xf32>
    %c0_36 = arith.constant 0 : index
    %c2_37 = arith.constant 2 : index
    %c0_38 = arith.constant 0 : index
    %c0_39 = arith.constant 0 : index
    %40 = vector.load %arg7[%c0_36, %c2_37, %c0_38, %c0_39] : memref<1x4x8x8xf32, #tpu.memory_space<vmem>>, vector<1x1x8x8xf32>
    %41 = vector.shape_cast %40 : vector<1x1x8x8xf32> to vector<8x8xf32>
    %42 = vector.shape_cast %39 : vector<8x8xf32> to vector<1x1x8x8xf32>
    tpu.vector_store %arg7[%c0_36, %c2_37, %c0_38, %c0_39], %42 {strides = array<i32>} : memref<1x4x8x8xf32, #tpu.memory_space<vmem>>, vector<1x1x8x8xf32>,
    %43 = vector.extract_strided_slice %6 {offsets = [0, 24], sizes = [8, 8], strides = [1, 1]} : vector<8x96xf32> to vector<8x8xf32>
    %c0_40 = arith.constant 0 : index
    %c3 = arith.constant 3 : index
    %c0_41 = arith.constant 0 : index
    %c0_42 = arith.constant 0 : index
    %44 = vector.load %arg5[%c0_40, %c3, %c0_41, %c0_42] : memref<1x4x8x8xf32, #tpu.memory_space<vmem>>, vector<1x1x8x8xf32>
    %45 = vector.shape_cast %44 : vector<1x1x8x8xf32> to vector<8x8xf32>
    %46 = vector.shape_cast %43 : vector<8x8xf32> to vector<1x1x8x8xf32>
    tpu.vector_store %arg5[%c0_40, %c3, %c0_41, %c0_42], %46 {strides = array<i32>} : memref<1x4x8x8xf32, #tpu.memory_space<vmem>>, vector<1x1x8x8xf32>,
    %47 = vector.extract_strided_slice %6 {offsets = [0, 56], sizes = [8, 8], strides = [1, 1]} : vector<8x96xf32> to vector<8x8xf32>
    %c0_43 = arith.constant 0 : index
    %c3_44 = arith.constant 3 : index
    %c0_45 = arith.constant 0 : index
    %c0_46 = arith.constant 0 : index
    %48 = vector.load %arg6[%c0_43, %c3_44, %c0_45, %c0_46] : memref<1x4x8x8xf32, #tpu.memory_space<vmem>>, vector<1x1x8x8xf32>
    %49 = vector.shape_cast %48 : vector<1x1x8x8xf32> to vector<8x8xf32>
    %50 = vector.shape_cast %47 : vector<8x8xf32> to vector<1x1x8x8xf32>
    tpu.vector_store %arg6[%c0_43, %c3_44, %c0_45, %c0_46], %50 {strides = array<i32>} : memref<1x4x8x8xf32, #tpu.memory_space<vmem>>, vector<1x1x8x8xf32>,
    %51 = vector.extract_strided_slice %6 {offsets = [0, 88], sizes = [8, 8], strides = [1, 1]} : vector<8x96xf32> to vector<8x8xf32>
    %c0_47 = arith.constant 0 : index
    %c3_48 = arith.constant 3 : index
    %c0_49 = arith.constant 0 : index
    %c0_50 = arith.constant 0 : index
    %52 = vector.load %arg7[%c0_47, %c3_48, %c0_49, %c0_50] : memref<1x4x8x8xf32, #tpu.memory_space<vmem>>, vector<1x1x8x8xf32>
    %53 = vector.shape_cast %52 : vector<1x1x8x8xf32> to vector<8x8xf32>
    %54 = vector.shape_cast %51 : vector<8x8xf32> to vector<1x1x8x8xf32>
    tpu.vector_store %arg7[%c0_47, %c3_48, %c0_49, %c0_50], %54 {strides = array<i32>} : memref<1x4x8x8xf32, #tpu.memory_space<vmem>>, vector<1x1x8x8xf32>,
    return
  }
  func.func @transform_0(%arg0: i32, %arg1: i32) -> (i32, i32, i32) {
    %c0_i32 = arith.constant 0 : i32
    %c0_i32_0 = arith.constant 0 : i32
    return %arg0, %arg1, %c0_i32 : i32, i32, i32
  }
  func.func @transform_1(%arg0: i32, %arg1: i32) -> (i32, i32) {
    %c0_i32 = arith.constant 0 : i32
    %c0_i32_0 = arith.constant 0 : i32
    %c0_i32_1 = arith.constant 0 : i32
    return %c0_i32, %c0_i32_0 : i32, i32
  }
  func.func @transform_2(%arg0: i32, %arg1: i32) -> (i32, i32) {
    %c0_i32 = arith.constant 0 : i32
    %c0_i32_0 = arith.constant 0 : i32
    %c0_i32_1 = arith.constant 0 : i32
    return %c0_i32, %c0_i32_0 : i32, i32
  }
  func.func @transform_3(%arg0: i32, %arg1: i32) -> (i32, i32, i32, i32) {
    %c0_i32 = arith.constant 0 : i32
    %c0_i32_0 = arith.constant 0 : i32
    %c0_i32_1 = arith.constant 0 : i32
    return %arg0, %c0_i32, %arg1, %c0_i32_0 : i32, i32, i32, i32
  }
  func.func @transform_4(%arg0: i32, %arg1: i32) -> (i32, i32, i32, i32) {
    %c0_i32 = arith.constant 0 : i32
    %c0_i32_0 = arith.constant 0 : i32
    %c0_i32_1 = arith.constant 0 : i32
    return %arg0, %c0_i32, %arg1, %c0_i32_0 : i32, i32, i32, i32
  }
  func.func @transform_5(%arg0: i32, %arg1: i32) -> (i32, i32, i32, i32) {
    %c0_i32 = arith.constant 0 : i32
    %c0_i32_0 = arith.constant 0 : i32
    %c0_i32_1 = arith.constant 0 : i32
    return %arg0, %c0_i32, %arg1, %c0_i32_0 : i32, i32, i32, i32
  }
}

</mosaic_0001>

<bundles_post_ra>
// kernel: tpu_custom_call.1
= control target key start
LH: loop header
LB: loop body
LE: loop exit
PB: predicated region body
PF: predicated region fallthrough
CT: control target
= control target key end

     0   :  { %11 = vsyncpa [#allocation3], 0  ;;  %s1402_s0 = inlined_call_operand.hbm [shape: f32[2,8,32], index: 0, kind: input, shape index: {}]   ;;  %s1403_s1 = inlined_call_operand.hbm [shape: f32[32,96], index: 1, kind: input, shape index: {}]   ;;  %s1404_s2 = inlined_call_operand.vmem [shape: f32[1,96], index: 2, kind: input, shape index: {}]   ;;  %s1405_s3 = inlined_call_operand.hbm [shape: f32[2,4,8,8], index: 3, kind: output, shape index: {0}]   ;;  %s1406_s4 = inlined_call_operand.hbm [shape: f32[2,4,8,8], index: 4, kind: output, shape index: {1}]   ;;  %s1407_s5 = inlined_call_operand.hbm [shape: f32[2,4,8,8], index: 5, kind: output, shape index: {2}]  }
   0x1   :  { %13 = vsyncpa [#allocation3 + $0x1], 0 }
   0x2   :  { %14 = vsyncpa [#allocation6], 0 }
   0x3   :  { %15 = vsyncpa [#allocation4], 0 }
   0x4   :  { %17 = vsyncpa [#allocation4 + $0x1], 0 }
   0x5   :  { %18 = vsyncpa [#allocation9], 0 }
   0x6   :  { %20 = vsyncpa [#allocation9 + $0x1], 0  ;;  %s1074_s18 = smov 0   ;;  %s1076_s19 = smov 0  }
   0x7   :  { %s1078_s20 = smov 0   ;;  %s1080_s21 = smov 0  }
   0x8   :  { %s1082_s22 = smov 0   ;;  %s1084_s23 = smov 0  }
   0x9 LB: > { %s1105_s24 = sadd.s32 4294967295, %s1019_s23   ;;  %s1411_s25 = sadd.s32 4294967294, %s1019_s23   ;;  %s1019_s23 = sphi %s1084_s23, %s26_s23   ;;  %s1015_s22 = sphi %s1082_s22, %s1433_s22   ;;  %s1011_s21 = sphi %s1080_s21, %s1432_s21   ;;  %s1007_s20 = sphi %s1078_s20, %s1431_s20   ;;  %s1003_s19 = sphi %s1076_s19, %s1430_s19   ;;  %s999_s18 = sphi %s1074_s18, %s1429_s18  }
   0xa   : > { %p60_p0 = scmp.ne.s32.totalorder %s1003_s19, %s999_s18  ;;  %p1408_p1 = scmp.eq.s32.totalorder %s1105_s24, 0 }
   0xb   : > { %p134_p3 = scmp.eq.s32.totalorder %s1411_s25, 1  ;;  %p656_p5 = scmp.ge.s32.totalorder %s1019_s23, 1 }
   0xc   : > { %p1116_p4 = por %p1408_p1, %p60_p0  ;;  %p197_p7 = scmp.lt.s32.totalorder %s1019_s23, 3 }
   0xd   : > { %p1121_p6 = por %p134_p3, %p60_p0  ;;  %s1021_s29 = smov [#allocation5]  }
   0xe   : > { %s1412_s26 = scalar_select %p1116_p4, 1, 0 }
   0xf   : > { %s1413_s27 = scalar_select %p1121_p6, 1, 0 }
  0x10   : > { %p1126_p8 = pnand %p656_p5, %p197_p7  ;;  %s209_s30 = sshll.u32 %s1021_s29, 4  ;;  %s210_s30 = int_to_ptr.vmem [resolvable:$true] %s209_s30 }
  0x11   : > { %s38_s7 = sadd.s32 1, %s1015_s22  ;;  %s815_s10 = scalar_lea.hbm %s1403_s1, 512 }
  0x12   : > { %s1414_s28 = scalar_select %p1126_p8, 1, 0 }
  0x13   : > { %p726_p9 = pneg %p1126_p8  ;;  %p816_p12 = scmp.ne.s32.totalorder %s1403_s1, %s815_s10 }
  0x14   : > { %p822_p5 = scmp.lt.u32.totalorder %s815_s10, %s1403_s1 }
  0x15   : > { %p1135_p11 = pnand %p726_p9, %p1408_p1 }
  0x17   : > { %p817_p13 = pneg %p1135_p11 }
  0x19   : > { %p818_p0 = pnand %p817_p13, %p816_p12 }
  0x1b   : > { %p819_p3 = pneg %p818_p0 }
  0x1d   : > { %p824_p7 = pnand %p822_p5, %p819_p3 }
  0x1f   : > { %827 = shalt.err (!%p824_p7)
}
  0x20   : > { %s828_s15 = scalar_lea.vmem %s210_s30, 512  ;;  %p836_p2 = scmp.lt.s32.totalorder %s210_s30, %s210_s30 }
  0x21   : > { %p829_p9 = scmp.ne.s32.totalorder %s210_s30, %s828_s15  ;;  %p837_p6 = scmp.lt.s32.totalorder %s828_s15, %s828_s15 }
  0x23   : > { %p831_p10 = pnand %p829_p9, %p817_p13  ;;  %p838_p4 = por %p837_p6, %p836_p2 }
  0x25   : > { %p832_p1 = pneg %p831_p10 }
  0x27   : > { %p839_p8 = pnand %p838_p4, %p832_p1 }
  0x29   : > { %842 = shalt.err (!%p839_p8)
}
  0x2a   : > { %s1022_s16 = smov 128   ;;  %s1023_s17 = smov 8  }
  0x2b   : > { %729 = dma.hbm_to_vmem [thread:$0]  (!%p1135_p11), %s1403_s1, 512, %s210_s30, [#allocation6], %s1022_s16, %s1022_s16, %s1023_s17  }
  0x2c   : > { %p40_p1 = scmp.ge.s32.totalorder %s38_s7, 2  ;;  %s47_s9 = sadd.s32 1, %s1007_s20 }
  0x2d   : > { %p54_p2 = scmp.ne.s32.totalorder %s1007_s20, %s1003_s19  ;;  %p55_p4 = scmp.eq.s32.totalorder %s1019_s23, 0 }
  0x2e   : > { %s1435_s7 = smov (%p40_p1, %s38_s7), 0  ;;  %p1417_p8 = scmp.eq.s32.totalorder %s1105_s24, 1 }
  0x2f   : > { %p1162_p6 = por %p55_p4, %p54_p2  ;;  %s42_s6 = ssub.s32 %s1015_s22, %s1435_s7 }
  0x30   : > { %p1168_p10 = por %p1417_p8, %p54_p2  ;;  %p745_p12 = scmp.lt.s32.totalorder %s1019_s23, 2 }
  0x31   : > { %p45_p11 = scmp.eq.s32.totalorder %s42_s6, 0  ;;  %s226_s30 = sand.u32 1, %s1007_s20  }
  0x32   : > { %s659_s12 = sshll.u32 %s226_s30, 3  ;;  %s660_s14 = sshll.u32 %s1015_s22, 7 }
  0x33   : > { %s1177_s13 = scalar_select %p45_p11, %s1007_s20, %s47_s9  }
  0x34   : > { %s1183_s17 = scalar_lea.hbm %s1402_s0, %s660_s14  ;;  %s230_s29 = scalar_lea.vmem [#allocation2], %s659_s12 }
  0x35   : > { %s238_s8 = sshll.u32 %s230_s29, 4  ;;  %p1189_p13 = pnand %p745_p12, %p1162_p6  ;;  %s1185_s8 = int_to_ptr.vmem [resolvable:$true] %s238_s8 }
  0x36   : > { %s227_s9 = scalar_lea.sflag [#allocation3], %s226_s30  ;;  %s843_s25 = scalar_lea.hbm %s1183_s17, 128 }
  0x37   : > { %p844_p0 = scmp.ne.s32.totalorder %s1183_s17, %s843_s25  ;;  %p845_p3 = pneg %p1189_p13 }
  0x38   : > { %s848_s15 = scalar_lea.hbm %s1402_s0, 256  ;;  %p849_p9 = scmp.lt.u32.totalorder %s1183_s17, %s1402_s0 }
  0x39   : > { %p846_p5 = pnand %p845_p3, %p844_p0  ;;  %p850_p1 = scmp.lt.u32.totalorder %s848_s15, %s843_s25 }
  0x3a   : > { %p852_p4 = scmp.lt.u32.totalorder %s843_s25, %s1183_s17 }
  0x3b   : > { %p847_p7 = pneg %p846_p5  ;;  %p851_p2 = por %p850_p1, %p849_p9 }
  0x3d   : > { %p853_p6 = por %p852_p4, %p851_p2 }
  0x3f   : > { %p854_p8 = pnand %p853_p6, %p847_p7 }
  0x41   : > { %857 = shalt.err (!%p854_p8)
}
  0x42   : > { %s858_s30 = scalar_lea.vmem %s1185_s8, 128  ;;  %s1024_s29 = smov [#allocation2]  }
  0x43   : > { %p859_p12 = scmp.ne.s32.totalorder %s1185_s8, %s858_s30  ;;  %s863_s12 = sshll.u32 %s1024_s29, 4  ;;  %s864_s12 = int_to_ptr.vmem [resolvable:$false] %s863_s12 }
  0x44   : > { %s865_s14 = scalar_lea.vmem %s864_s12, 256  ;;  %p866_p5 = scmp.lt.s32.totalorder %s1185_s8, %s864_s12 }
  0x45   : > { %p861_p11 = pnand %p859_p12, %p845_p3  ;;  %p867_p9 = scmp.lt.s32.totalorder %s865_s14, %s858_s30 }
  0x47   : > { %p862_p0 = pneg %p861_p11  ;;  %p868_p1 = por %p867_p9, %p866_p5 }
  0x49   : > { %p869_p2 = pnand %p868_p1, %p862_p0 }
  0x4b   : > { %872 = shalt.err (!%p869_p2)
}
  0x4c   : > { %733 = dma.hbm_to_vmem [thread:$0]  (!%p1189_p13), %s1183_s17, 128, %s1185_s8, %s227_s9  }
  0x4d   : > { %p1420_p7 = scmp.ne.s32.totalorder %s1414_s28, 0 }
  0x4e   : > { %s1221_s25 = sand.u32 (!%p1420_p7), 1, %s1003_s19   ;;  %p1421_p3 = scmp.ne.s32.totalorder (!%p1420_p7), %s1412_s26, 0 }
  0x4f   : > { %247 = sbr.rel (%p1420_p7) target bundleno = 496 (0x1f0), region = 32  ;;  %s662_s15 = sshll.u32 (!%p1420_p7), %s1221_s25, 3 }
  0x50   : > { %s250_s10 = scalar_lea.sflag (!%p1420_p7), [#allocation3], %s1221_s25  ;;  %s253_s16 = scalar_lea.vmem (!%p1420_p7), [#allocation2], %s662_s15 }
  0x56   : > { %982 = dma.done.wait (%p1421_p3), %s250_s10, 128  }
  0x57   : > { %984 = vsyncadd (%p1421_p3), %s250_s10, 4294967168  ;;  %p1422_p4 = scmp.eq.s32.totalorder %s1105_s24, 0 }
  0x59   : > { %986 = dma.done.wait (%p1422_p4), [#allocation6], 512   ;;  %p1423_p13 = pmov %p1422_p4 }
  0x5a   : > { %v1025_v0 = vmov 0.0|0.0   ;;  %vm1026_vm0 = vmmov 0   ;;  %v1027_v1 = vmov 0.0   ;;  %v295_v2 = vld [vmem:[#allocation5] sm:$0xff]  ;;  %v296_v3 = vld [vmem:[#allocation5 + $0x8] sm:$0xff]  ;;  %v297_v4 = vld [vmem:[#allocation5 + $0x10] sm:$0xff] }
  0x5b   : > { %988 = vsyncadd (%p1423_p13), [#allocation6], 4294966784  ;;  %708 = vmatprep.subr.bf16.mxu0 %v1025_v0  ;;  %705 = vmatprep.mubr.msk.f32.mxu0 %vm1026_vm0, %v1027_v1  ;;  %v709_v5 = vpack.c.bf16 %v296_v3, %v295_v2  ;;  %v298_v6 = vld [vmem:[#allocation5 + $0x18] sm:$0xff]  ;;  %vm306_vm1 = vcmask 261120   ;;  %s1234_s26 = sshll.u32 %s1221_s25, 5  ;;  %vm380_vm2 = vcmask 64512  }
  0x5c   : > { %v712_v7 = vpack.c.bf16 %v298_v6, %v297_v4  ;;  %v294_v8 = vld [vmem:[%s253_s16] sm:$0xff]  ;;  %s1028_s8 = smov 80   ;;  %s1029_s6 = smov 96  }
  0x5d   : > { %710 = vmatpush3.bf16.msra.mxu0 %v709_v5  ;;  %v667_v9 = vld [vmem:[%s1404_s2] ss:$0 sm:$0xff]  ;;  %s1240_s9 = scalar_lea.vmem [#allocation7], %s1234_s26  ;;  %s1030_s30 = smov 72  }
  0x5e   : > { %711 = vmatprep.subr.bf16.mxu0 %v1025_v0  ;;  %s1031_s29 = smov 88   ;;  %s1032_s12 = smov 120  }
  0x5f   : > { %s1033_s14 = smov 64   ;;  %s1034_s15 = smov 112  }
  0x60   : > { %s1035_s10 = smov 56   ;;  %s1036_s16 = smov 104  }
  0x61   : > { %713 = vmatpush3.bf16.msra.mxu0 %v712_v7  ;;  %s1037_s28 = smov 48   ;;  %s1038_s17 = smov 40  }
  0x64   : > { %706 = vmatmul.mubr.msk.f32.vlgmr.msra.gmra.mrb[0].mxu0 %vm306_vm1, %v294_v8 }
 0x137   : > { %v376_v10 = vpop.f32.mrb[0].mxu0 }
 0x138   : > { %v377_v11 = vadd.f32 %v667_v9, %v376_v10  ;;  %v707_v12 = vpop.f32.mrb[1].mxu0 }
 0x13a   : > { %411 = vrot.lane.b32.xlu1 %v377_v11, %s1028_s8  ;;  %383 = vrot.lane.b32.xlu0 %v377_v11, %s1029_s6  ;;  %381 = vst.msk [vmem:[%s1240_s9] sm:$0xff] %vm380_vm2, %v377_v11  ;;  %s286_s8 = scalar_lea.vmem [#allocation8], %s1234_s26 }
 0x13b   : > { %s478_s6 = sshll.u32 %s286_s8, 4  ;;  %s1249_s6 = int_to_ptr.vmem [resolvable:$true] %s478_s6 }
 0x13e   : > { %426 = vrot.lane.b32.xlu1 %v377_v11, %s1030_s30  ;;  %396 = vrot.lane.b32.xlu0 %v377_v11, %s1031_s29  ;;  %s441_s30 = sand.u32 1, %s1105_s24   ;;  %s1247_s29 = sshll.u32 %s1011_s21, 9 }
 0x13f   : > { %s1261_s21 = scalar_lea.sflag [#allocation9], %s441_s30  ;;  %s873_s24 = scalar_lea.vmem %s1249_s6, 512 }
 0x140   : > { %p874_p6 = scmp.ne.s32.totalorder %s1249_s6, %s873_s24 }
 0x142   : > { %391 = vrot.lane.b32.xlu1 %v377_v11, %s1032_s12  ;;  %387 = vrot.lane.b32.xlu0 %v377_v11, %s1033_s14  ;;  %p875_p8 = pnand %p874_p6, %p1168_p10 }
 0x144   : > { %p876_p12 = pneg %p875_p8 }
 0x146   : > { %406 = vrot.lane.b32.xlu1 %v377_v11, %s1034_s15  ;;  %401 = vrot.lane.b32.xlu0 %v377_v11, %s1035_s10  ;;  %s1257_s15 = scalar_lea.hbm %s1406_s4, %s1247_s29  ;;  %s1039_s10 = smov [#allocation8]  }
 0x14a   : > { %421 = vrot.lane.b32.xlu1 %v377_v11, %s1036_s16  ;;  %416 = vrot.lane.b32.xlu0 %v377_v11, %s1037_s28  ;;  %s877_s16 = sshll.u32 %s1039_s10, 4  ;;  %s878_s16 = int_to_ptr.vmem [resolvable:$false] %s877_s16 }
 0x14b   : > { %s879_s28 = scalar_lea.vmem %s878_s16, 1024  ;;  %p880_p11 = scmp.lt.s32.totalorder %s1249_s6, %s878_s16 }
 0x14c   : > { %p881_p0 = scmp.lt.s32.totalorder %s879_s28, %s873_s24 }
 0x14e   : > { %431 = vrot.lane.b32.xlu0 %v377_v11, %s1038_s17  ;;  %p882_p5 = por %p881_p0, %p880_p11 }
 0x150   : > { %p883_p9 = pnand %p882_p5, %p876_p12 }
 0x1ac   : > { %v412_v13 = vpop.permute.xlu1 %411  ;;  %v384_v14 = vpop.permute.xlu0 %383 }
 0x1ad   : > { %673 = vst.msk [vmem:[%s286_s8 + $0x10] sm:$0xff] %vm380_vm2, %v412_v13  ;;  %386 = vst.msk [vmem:[%s286_s8] sm:$0xff] %vm380_vm2, %v384_v14 }
 0x1b0   : > { %v427_v15 = vpop.permute.xlu1 %426  ;;  %v397_v16 = vpop.permute.xlu0 %396 }
 0x1b1   : > { %676 = vst.msk [vmem:[%s286_s8 + $0x18] sm:$0xff] %vm380_vm2, %v427_v15  ;;  %670 = vst.msk [vmem:[%s286_s8 + $0x8] sm:$0xff] %vm380_vm2, %v397_v16 }
 0x1b2   : > { %886 = shalt.err (!%p883_p9)
}
 0x1b3   : > { %s887_s17 = scalar_lea.hbm %s1257_s15, 512  ;;  %s891_s12 = scalar_lea.hbm %s1406_s4, 1024 }
 0x1b4   : > { %p888_p1 = scmp.ne.s32.totalorder %s1257_s15, %s887_s17  ;;  %p892_p3 = scmp.lt.u32.totalorder %s1257_s15, %s1406_s4 }
 0x1b5   : > { %p893_p4 = scmp.lt.u32.totalorder %s891_s12, %s887_s17  ;;  %p895_p6 = scmp.lt.u32.totalorder %s887_s17, %s1257_s15 }
 0x1b6   : > { %p889_p2 = pnand %p888_p1, %p1168_p10 }
 0x1b7   : > { %p894_p13 = por %p893_p4, %p892_p3 }
 0x1b8   : > { %p890_p7 = pneg %p889_p2 }
 0x1b9   : > { %p896_p8 = por %p895_p6, %p894_p13 }
 0x1bb   : > { %p897_p12 = pnand %p896_p8, %p890_p7 }
 0x1bd   : > { %900 = shalt.err (!%p897_p12)
}
 0x1be   : > { %s1040_s24 = smov 128   ;;  %s1041_s16 = smov 8   ;;  %v392_v17 = vpop.permute.xlu1 %391  ;;  %v388_v18 = vpop.permute.xlu0 %387 }
 0x1bf   : > { %721 = dma.vmem_to_hbm [thread:$0]  (%p1168_p10), %s1249_s6, 512, %s1257_s15, %s1261_s21, %s1040_s24, %s1040_s24, %s1041_s16  }
 0x1c0   : > { %669 = vst.msk [vmem:[%s1240_s9 + $0x8] sm:$0xff] %vm380_vm2, %v392_v17  ;;  %s1291_s28 = scalar_lea.vmem [#allocation10], %s1234_s26  ;;  %s461_s17 = sshll.u32 %s1240_s9, 4  ;;  %s1300_s17 = int_to_ptr.vmem [resolvable:$true] %s461_s17 }
 0x1c1   : > { %390 = vst.msk [vmem:[%s1291_s28] sm:$0xff] %vm380_vm2, %v388_v18  ;;  %s1306_s26 = scalar_lea.hbm %s1405_s3, %s1247_s29  ;;  %s901_s12 = scalar_lea.vmem %s1300_s17, 512 }
 0x1c2   : > { %v407_v19 = vpop.permute.xlu1 %406  ;;  %v402_v20 = vpop.permute.xlu0 %401  ;;  %p902_p11 = scmp.ne.s32.totalorder %s1300_s17, %s901_s12  ;;  %s1042_s14 = smov [#allocation7]  }
 0x1c3   : > { %672 = vst.msk [vmem:[%s1240_s9 + $0x10] sm:$0xff] %vm380_vm2, %v407_v19  ;;  %671 = vst.msk [vmem:[%s1291_s28 + $0x8] sm:$0xff] %vm380_vm2, %v402_v20  ;;  %s905_s10 = sshll.u32 %s1042_s14, 4  ;;  %s906_s10 = int_to_ptr.vmem [resolvable:$false] %s905_s10 }
 0x1c4   : > { %p903_p0 = pnand %p902_p11, %p1168_p10  ;;  %s907_s6 = scalar_lea.vmem %s906_s10, 1024 }
 0x1c5   : > { %p908_p9 = scmp.lt.s32.totalorder %s1300_s17, %s906_s10  ;;  %p909_p1 = scmp.lt.s32.totalorder %s907_s6, %s901_s12 }
 0x1c6   : > { %v422_v21 = vpop.permute.xlu1 %421  ;;  %v417_v22 = vpop.permute.xlu0 %416  ;;  %p904_p5 = pneg %p903_p0 }
 0x1c7   : > { %675 = vst.msk [vmem:[%s1240_s9 + $0x18] sm:$0xff] %vm380_vm2, %v422_v21  ;;  %674 = vst.msk [vmem:[%s1291_s28 + $0x10] sm:$0xff] %vm380_vm2, %v417_v22  ;;  %p910_p2 = por %p909_p1, %p908_p9 }
 0x1c9   : > { %p911_p7 = pnand %p910_p2, %p904_p5 }
 0x1cb   : > { %914 = shalt.err (!%p911_p7)
}
 0x1cc   : > { %s915_s9 = scalar_lea.hbm %s1306_s26, 512  ;;  %s919_s14 = scalar_lea.hbm %s1405_s3, 1024 }
 0x1cd   : > { %p916_p3 = scmp.ne.s32.totalorder %s1306_s26, %s915_s9  ;;  %p920_p6 = scmp.lt.u32.totalorder %s1306_s26, %s1405_s3 }
 0x1ce   : > { %p921_p8 = scmp.lt.u32.totalorder %s919_s14, %s915_s9  ;;  %p923_p11 = scmp.lt.u32.totalorder %s915_s9, %s1306_s26 }
 0x1cf   : > { %p917_p4 = pnand %p916_p3, %p1168_p10 }
 0x1d0   : > { %p922_p12 = por %p921_p8, %p920_p6 }
 0x1d1   : > { %p918_p13 = pneg %p917_p4 }
 0x1d2   : > { %p924_p0 = por %p923_p11, %p922_p12 }
 0x1d4   : > { %p925_p5 = pnand %p924_p0, %p918_p13 }
 0x1d6   : > { %928 = shalt.err (!%p925_p5)
}
 0x1d7   : > { %s1424_s12 = scalar_lea.sflag [#allocation4], %s1221_s25  ;;  %s1425_s8 = sshll.u32 %s1291_s28, 4  ;;  %v432_v23 = vpop.permute.xlu0 %431  ;;  %s1342_s8 = int_to_ptr.vmem [resolvable:$true] %s1425_s8 }
 0x1d8   : > { %720 = dma.vmem_to_hbm [thread:$0]  (%p1168_p10), %s1300_s17, 512, %s1306_s26, %s1424_s12, %s1040_s24, %s1040_s24, %s1041_s16  }
 0x1d9   : > { %s1348_s9 = scalar_lea.hbm %s1407_s5, %s1247_s29  ;;  %677 = vst.msk [vmem:[%s1291_s28 + $0x18] sm:$0xff] %vm380_vm2, %v432_v23  ;;  %s929_s25 = scalar_lea.vmem %s1342_s8, 512 }
 0x1da   : > { %p930_p9 = scmp.ne.s32.totalorder %s1342_s8, %s929_s25  ;;  %s1043_s17 = smov [#allocation10]  }
 0x1db   : > { %s933_s26 = sshll.u32 %s1043_s17, 4  ;;  %s934_s26 = int_to_ptr.vmem [resolvable:$false] %s933_s26 }
 0x1dc   : > { %p931_p1 = pnand %p930_p9, %p1168_p10  ;;  %s935_s15 = scalar_lea.vmem %s934_s26, 1024 }
 0x1dd   : > { %p936_p7 = scmp.lt.s32.totalorder %s1342_s8, %s934_s26  ;;  %p937_p3 = scmp.lt.s32.totalorder %s935_s15, %s929_s25 }
 0x1de   : > { %p932_p2 = pneg %p931_p1 }
 0x1df   : > { %p938_p4 = por %p937_p3, %p936_p7 }
 0x1e1   : > { %p939_p13 = pnand %p938_p4, %p932_p2 }
 0x1e3   : > { %942 = shalt.err (!%p939_p13)
}
 0x1e4   : > { %s943_s29 = scalar_lea.hbm %s1348_s9, 512  ;;  %s947_s10 = scalar_lea.hbm %s1407_s5, 1024 }
 0x1e5   : > { %p944_p6 = scmp.ne.s32.totalorder %s1348_s9, %s943_s29  ;;  %p948_p11 = scmp.lt.u32.totalorder %s1348_s9, %s1407_s5 }
 0x1e6   : > { %p949_p0 = scmp.lt.u32.totalorder %s947_s10, %s943_s29  ;;  %p951_p9 = scmp.lt.u32.totalorder %s943_s29, %s1348_s9 }
 0x1e7   : > { %p945_p8 = pnand %p944_p6, %p1168_p10 }
 0x1e8   : > { %p950_p5 = por %p949_p0, %p948_p11 }
 0x1e9   : > { %p946_p12 = pneg %p945_p8 }
 0x1ea   : > { %p952_p1 = por %p951_p9, %p950_p5 }
 0x1ec   : > { %p953_p2 = pnand %p952_p1, %p946_p12 }
 0x1ee   : > { %956 = shalt.err (!%p953_p2)
}
 0x1ef   : > { %722 = dma.vmem_to_hbm [thread:$0]  (%p1168_p10), %s1342_s8, 512, %s1348_s9, %s1261_s21, %s1040_s24, %s1040_s24, %s1041_s16  }
 0x1f0 PF: > { %s510_s6 = sand.u32 1, %s999_s18   ;;  %p1426_p7 = scmp.ne.s32.totalorder %s1413_s27, 0 }
 0x1f1   : > { %p1427_p3 = scmp.ge.s32.totalorder %s1019_s23, 2  ;;  %s511_s25 = scalar_lea.sflag [#allocation4], %s510_s6 }
 0x1f3   : > { %p735_p4 = pnand %p1427_p3, %p1426_p7 }
 0x1f5   : > { %990 = dma.done.wait (!%p735_p4), %s511_s25, 512  }
 0x1f6   : > { %992 = vsyncadd (!%p735_p4), %s511_s25, 4294966784  ;;  %s1428_s11 = sadd.s32 4294967294, %s1019_s23  }
 0x1f7   : > { %s519_s17 = sand.u32 1, %s1428_s11  }
 0x1f8   : > { %s520_s26 = scalar_lea.sflag [#allocation9], %s519_s17 }
 0x1f9   : > { %994 = dma.done.wait (!%p735_p4), %s520_s26, 1024  }
 0x1fa   : > { %996 = vsyncadd (!%p735_p4), %s520_s26, 4294966272  ;;  %s26_s23 = sadd.s32 1, %s1019_s23   ;;  %s1429_s18 = smov %s1003_s19 }
 0x1fb   : > { %p23_p10 = scmp.ge.s32.totalorder %s26_s23, 4   ;;  %s1430_s19 = smov %s1007_s20 }
 0x1fc   : > { %s1431_s20 = smov %s1177_s13  ;;  %s1432_s21 = smov %s1015_s22 }
 0x1fd   : > { %s1433_s22 = smov %s1435_s7  ;;  %25 = sbr.rel (!%p23_p10) target bundleno = 9 (0x9), region = 122 }
 0x204   :  { %534 = vsyncpa [#allocation3], 1 }
 0x205   :  { %536 = vsyncpa [#allocation3 + $0x1], 1 }
 0x206   :  { %537 = vsyncpa [#allocation6], 1 }
 0x207   :  { %538 = vsyncpa [#allocation4], 1 }
 0x208   :  { %540 = vsyncpa [#allocation4 + $0x1], 1 }
 0x209   :  { %541 = vsyncpa [#allocation9], 1 }
 0x20a   :  { %543 = vsyncpa [#allocation9 + $0x1], 1 }

</bundles_post_ra>
